<compile_context>
chip_gen: v5e
topology: v5e:2x2
jax: 0.10.0
libtpu: 0.0.40
codegen_flags: <defaults>
</compile_context>

<pallas_src>
import jax
import jax.numpy as jnp
from jax.experimental import pallas as pl
from jax.experimental.pallas import tpu as pltpu


# ---------------------------------------------------------------------------
# Kernel
# ---------------------------------------------------------------------------
def _swiglu_mlp_kernel(x_ref, gu_ref, dw_ref, o_ref, acc_ref):
    # x_ref:   (TS, H)       token tile
    # gu_ref:  (H, 2*TI)     fused [gate_tile | up_tile] weight block
    # dw_ref:  (TI, H)       down_proj weight block (pre-transposed)
    # o_ref:   (TS, H)       output tile (resident across the I-reduction axis)
    # acc_ref: (TS, H) f32   VMEM accumulator
    j = pl.program_id(1)

    @pl.when(j == 0)
    def _init():
        acc_ref[...] = jnp.zeros_like(acc_ref)

    x = x_ref[...]
    ti = dw_ref.shape[0]

    # One MXU dot against the fused gate+up block -> (TS, 2*TI) in f32.
    gu = jnp.dot(x, gu_ref[...], preferred_element_type=jnp.float32)
    g = gu[:, :ti]
    u = gu[:, ti:]

    # SiLU in f32 (EUP sigmoid + VPU multiplies).
    h = (g * jax.nn.sigmoid(g)) * u

    # Partial down_proj, accumulated in f32.
    acc_ref[...] += jnp.dot(
        h.astype(x.dtype), dw_ref[...], preferred_element_type=jnp.float32
    )

    @pl.when(j == pl.num_programs(1) - 1)
    def _finalize():
        o_ref[...] = acc_ref[...].astype(o_ref.dtype)


# ---------------------------------------------------------------------------
# Tile selection helpers
# ---------------------------------------------------------------------------
def _round_up(x, m):
    return ((x + m - 1) // m) * m


def _largest_aligned_divisor(total, target, align=128):
    """Largest multiple of `align` that divides `total` and is <= target.

    Falls back to `total` (no tiling) if no aligned divisor exists or the
    dimension is already small.
    """
    if total <= target or total < align:
        return total
    t = min(target, total)
    t -= t % align
    while t >= align:
        if total % t == 0:
            return t
        t -= align
    return total


def _vmem_capacity_bytes():
    try:
        return int(pltpu.get_tpu_info().vmem_capacity_bytes)
    except Exception:
        return 64 * 1024 * 1024  # conservative (v7x per-TC VMEM)


# ---------------------------------------------------------------------------
# Module factory: one-time weight prep + reusable apply fn
# ---------------------------------------------------------------------------
def make_qwen25_vl_mlp(gate_w, up_w, down_w, *, block_s=256, block_i=1024):
    """Build the MLP apply function.

    gate_w, up_w: [I, H]   (PyTorch nn.Linear weight layout, bias=False)
    down_w:       [H, I]
    Weight layout conversion (transpose + gate/up fusion) is done ONCE here,
    mirroring a load-time conversion in production.
    """
    I, H = gate_w.shape
    assert up_w.shape == (I, H)
    assert down_w.shape == (H, I)

    # Pick the intermediate tile (aligned to 128 lanes when possible).
    ti = _largest_aligned_divisor(I, block_i, align=128)
    n_i = I // ti

    # Fuse gate+up into [H, 2*I] with per-TI interleaving: block j (width 2*TI)
    # is [gate_tile_j | up_tile_j], so one BlockSpec streams both weights.
    gt = gate_w.T.reshape(H, n_i, ti)
    ut = up_w.T.reshape(H, n_i, ti)
    gu_w = jnp.concatenate([gt, ut], axis=2).reshape(H, 2 * I)
    dw_t = down_w.T  # (I, H), contiguous in TI-row blocks

    w_item = jnp.dtype(gu_w.dtype).itemsize

    def apply(x):
        S, H_ = x.shape
        assert H_ == H

        # Token tile: big enough to fill MXU rows, padded to a multiple of 8.
        ts = min(block_s, _round_up(S, 8))
        s_pad = _round_up(S, ts)
        x_p = jnp.pad(x, ((0, s_pad - S), (0, 0))) if s_pad != S else x

        x_item = jnp.dtype(x.dtype).itemsize

        # VMEM footprint estimate (double-buffered pipelined operands + acc).
        est = (
            2 * ts * H * x_item            # x tiles
            + 2 * (H * 2 * ti) * w_item    # fused gate/up blocks
            + 2 * (ti * H) * w_item        # down blocks
            + 2 * ts * H * x_item          # output tiles
            + ts * H * 4                   # f32 accumulator
        )
        cap = _vmem_capacity_bytes()
        vmem_limit = int(min(max(int(est * 1.25), 32 * 1024 * 1024),
                             int(cap * 0.9)))

        out = pl.pallas_call(
            _swiglu_mlp_kernel,
            out_shape=jax.ShapeDtypeStruct((s_pad, H), x.dtype),
            grid_spec=pltpu.PrefetchScalarGridSpec(
                num_scalar_prefetch=0,
                grid=(s_pad // ts, n_i),   # (tokens: parallel, I: reduction)
                in_specs=[
                    pl.BlockSpec((ts, H), lambda i, j: (i, 0)),        # x
                    pl.BlockSpec((H, 2 * ti), lambda i, j: (0, j)),    # gate|up
                    pl.BlockSpec((ti, H), lambda i, j: (j, 0)),        # down
                ],
                out_specs=pl.BlockSpec((ts, H), lambda i, j: (i, 0)),
                scratch_shapes=[pltpu.VMEM((ts, H), jnp.float32)],
            ),
            compiler_params=pltpu.CompilerParams(
                dimension_semantics=("parallel", "arbitrary"),
                vmem_limit_bytes=vmem_limit,
            ),
        )(x_p, gu_w, dw_t)

        return out[:S] if s_pad != S else out

    return apply


# ---------------------------------------------------------------------------
# Reference (matches the PyTorch module's forward)
# ---------------------------------------------------------------------------
def _reference(hidden_state, gate_w, up_w, down_w):
    g = hidden_state @ gate_w.T
    u = hidden_state @ up_w.T
    h = (g * jax.nn.sigmoid(g)) * u
    return h @ down_w.T


if __name__ == "__main__":
    # Small config consistent with the module: hidden_size=32, intermediate_size=64.
    S, H, I = 16, 32, 64

    key = jax.random.PRNGKey(0)
    kx, kg, ku, kd, kx2 = jax.random.split(key, 5)

    x = jax.random.normal(kx, (S, H), dtype=jnp.float32)
    # nn.Linear(H, I, bias=False).weight has shape (I, H); down_proj: (H, I).
    gate_w = jax.random.normal(kg, (I, H), dtype=jnp.float32) * 0.05
    up_w = jax.random.normal(ku, (I, H), dtype=jnp.float32) * 0.05
    down_w = jax.random.normal(kd, (H, I), dtype=jnp.float32) * 0.05

    # One-time weight prep (load time), then a reusable apply fn.
    mlp = make_qwen25_vl_mlp(gate_w, up_w, down_w)
    mlp_jit = jax.jit(mlp)

    out = jax.block_until_ready(mlp_jit(x))
    ref = _reference(x, gate_w, up_w, down_w)
    assert out.shape == (S, H)
    assert jnp.allclose(out, ref, atol=1e-5, rtol=1e-5), "mismatch vs reference"

    # Also exercise the non-divisible-sequence (padding) path.
    x2 = jax.random.normal(kx2, (13, H), dtype=jnp.float32)
    out2 = jax.block_until_ready(jax.jit(mlp)(x2))
    ref2 = _reference(x2, gate_w, up_w, down_w)
    assert out2.shape == (13, H)
    assert jnp.allclose(out2, ref2, atol=1e-5, rtol=1e-5), "mismatch vs reference (padded)"

    print("KERNEL_OK")
</pallas_src>

<mosaic_0001>
module attributes {stable_mosaic.version = 11 : i64} {
  func.func @_swiglu_mlp_kernel(%arg0: i32, %arg1: i32, %arg2: memref<16x32xf32, #tpu.memory_space<vmem>>, %arg3: memref<32x128xf32, #tpu.memory_space<vmem>>, %arg4: memref<64x32xf32, #tpu.memory_space<vmem>>, %arg5: memref<16x32xf32, #tpu.memory_space<vmem>>, %arg6: memref<16x32xf32, #tpu.memory_space<vmem>>) attributes {dimension_semantics = [#tpu.dimension_semantics<parallel>, #tpu.dimension_semantics<arbitrary>], iteration_bounds = array<i64: 1, 1>, scalar_prefetch = 0 : i64, scratch_operands = 1 : i64, tpu.core_type = #tpu.core_type<tc>, window_params = [{transform_indices = @transform_0, window_bounds = array<i64: 16, 32>}, {transform_indices = @transform_1, window_bounds = array<i64: 32, 128>}, {transform_indices = @transform_2, window_bounds = array<i64: 64, 32>}, {transform_indices = @transform_3, window_bounds = array<i64: 16, 32>}]} {
    %c0_i32 = arith.constant 0 : i32
    %0 = arith.cmpi eq, %arg1, %c0_i32 : i32
    %1 = arith.extui %0 : i1 to i32
    %c0_i32_0 = arith.constant 0 : i32
    %2 = arith.cmpi ne, %1, %c0_i32_0 : i32
    scf.if %2 {
      %cst_14 = arith.constant 0.000000e+00 : f32
      %23 = vector.broadcast %cst_14 : f32 to vector<16x32xf32>
      %c0_15 = arith.constant 0 : index
      %c0_16 = arith.constant 0 : index
      %24 = vector.load %arg6[%c0_15, %c0_16] : memref<16x32xf32, #tpu.memory_space<vmem>>, vector<16x32xf32>
      tpu.vector_store %arg6[%c0_15, %c0_16], %23 {strides = array<i32>} : memref<16x32xf32, #tpu.memory_space<vmem>>, vector<16x32xf32>,
    } else {
    }
    %c0 = arith.constant 0 : index
    %c0_1 = arith.constant 0 : index
    %3 = vector.load %arg2[%c0, %c0_1] : memref<16x32xf32, #tpu.memory_space<vmem>>, vector<16x32xf32>
    %c0_2 = arith.constant 0 : index
    %c0_3 = arith.constant 0 : index
    %4 = vector.load %arg3[%c0_2, %c0_3] : memref<32x128xf32, #tpu.memory_space<vmem>>, vector<32x128xf32>
    %cst = arith.constant dense<0.000000e+00> : vector<16x128xf32>
    %5 = tpu.matmul %3, %4, %cst {dimension_numbers = #tpu.dot_dimension_numbers<[1], [0], [0], [1], [0, 0, 1, 1], [], []>} : vector<16x32xf32>, vector<32x128xf32>, vector<16x128xf32> -> vector<16x128xf32>
    %6 = vector.extract_strided_slice %5 {offsets = [0, 0], sizes = [16, 64], strides = [1, 1]} : vector<16x128xf32> to vector<16x64xf32>
    %7 = vector.extract_strided_slice %5 {offsets = [0, 64], sizes = [16, 64], strides = [1, 1]} : vector<16x128xf32> to vector<16x64xf32>
    %8 = arith.negf %6 : vector<16x64xf32>
    %9 = math.exp %8 : vector<16x64xf32>
    %cst_4 = arith.constant 1.000000e+00 : f32
    %10 = vector.broadcast %cst_4 : f32 to vector<16x64xf32>
    %11 = arith.addf %10, %9 : vector<16x64xf32>
    %12 = arith.divf %10, %11 : vector<16x64xf32>
    %13 = arith.mulf %6, %12 : vector<16x64xf32>
    %14 = arith.mulf %13, %7 : vector<16x64xf32>
    %c0_5 = arith.constant 0 : index
    %c0_6 = arith.constant 0 : index
    %15 = vector.load %arg6[%c0_5, %c0_6] : memref<16x32xf32, #tpu.memory_space<vmem>>, vector<16x32xf32>
    %c0_7 = arith.constant 0 : index
    %c0_8 = arith.constant 0 : index
    %16 = vector.load %arg4[%c0_7, %c0_8] : memref<64x32xf32, #tpu.memory_space<vmem>>, vector<64x32xf32>
    %cst_9 = arith.constant dense<0.000000e+00> : vector<16x32xf32>
    %17 = tpu.matmul %14, %16, %cst_9 {dimension_numbers = #tpu.dot_dimension_numbers<[1], [0], [0], [1], [0, 0, 1, 1], [], []>} : vector<16x64xf32>, vector<64x32xf32>, vector<16x32xf32> -> vector<16x32xf32>
    %18 = arith.addf %15, %17 : vector<16x32xf32>
    %c0_10 = arith.constant 0 : index
    %c0_11 = arith.constant 0 : index
    %19 = vector.load %arg6[%c0_10, %c0_11] : memref<16x32xf32, #tpu.memory_space<vmem>>, vector<16x32xf32>
    tpu.vector_store %arg6[%c0_10, %c0_11], %18 {strides = array<i32>} : memref<16x32xf32, #tpu.memory_space<vmem>>, vector<16x32xf32>,
    %c0_i32_12 = arith.constant 0 : i32
    %20 = arith.cmpi eq, %arg1, %c0_i32_12 : i32
    %21 = arith.extui %20 : i1 to i32
    %c0_i32_13 = arith.constant 0 : i32
    %22 = arith.cmpi ne, %21, %c0_i32_13 : i32
    scf.if %22 {
      %c0_14 = arith.constant 0 : index
      %c0_15 = arith.constant 0 : index
      %23 = vector.load %arg6[%c0_14, %c0_15] : memref<16x32xf32, #tpu.memory_space<vmem>>, vector<16x32xf32>
      %c0_16 = arith.constant 0 : index
      %c0_17 = arith.constant 0 : index
      %24 = vector.load %arg5[%c0_16, %c0_17] : memref<16x32xf32, #tpu.memory_space<vmem>>, vector<16x32xf32>
      tpu.vector_store %arg5[%c0_16, %c0_17], %23 {strides = array<i32>} : memref<16x32xf32, #tpu.memory_space<vmem>>, vector<16x32xf32>,
    } else {
    }
    return
  }
  func.func @transform_0(%arg0: i32, %arg1: i32) -> (i32, i32) {
    %c0_i32 = arith.constant 0 : i32
    %c0_i32_0 = arith.constant 0 : i32
    return %arg0, %c0_i32 : i32, i32
  }
  func.func @transform_1(%arg0: i32, %arg1: i32) -> (i32, i32) {
    %c0_i32 = arith.constant 0 : i32
    %c0_i32_0 = arith.constant 0 : i32
    return %c0_i32, %arg1 : i32, i32
  }
  func.func @transform_2(%arg0: i32, %arg1: i32) -> (i32, i32) {
    %c0_i32 = arith.constant 0 : i32
    %c0_i32_0 = arith.constant 0 : i32
    return %arg1, %c0_i32 : i32, i32
  }
  func.func @transform_3(%arg0: i32, %arg1: i32) -> (i32, i32) {
    %c0_i32 = arith.constant 0 : i32
    %c0_i32_0 = arith.constant 0 : i32
    return %arg0, %c0_i32 : i32, i32
  }
}

</mosaic_0001>

<bundles_post_ra>
// kernel: apply.1
= control target key start
LH: loop header
LB: loop body
LE: loop exit
PB: predicated region body
PF: predicated region fallthrough
CT: control target
= control target key end

     0   :  { %8 = vsyncpa [#allocation4], 0  ;;  %s422_s0 = inlined_call_operand.hbm [shape: f32[16,32], index: 0, kind: input, shape index: {}]   ;;  %s423_s1 = inlined_call_operand.hbm [shape: f32[32,128], index: 1, kind: input, shape index: {}]   ;;  %s424_s2 = inlined_call_operand.hbm [shape: f32[64,32], index: 2, kind: input, shape index: {}]   ;;  %s425_s3 = inlined_call_operand.hbm [shape: f32[16,32], index: 3, kind: output, shape index: {}]  }
   0x1   :  { %9 = vsyncpa [#allocation7], 0 }
   0x2   :  { %10 = vsyncpa [#allocation5], 0  ;;  %s28_s14 = sshll.u32 %s423_s1, 4  ;;  %s362_s15 = smov [#allocation6]   ;;  %s29_s14 = int_to_ptr.hbm [resolvable:$true] %s28_s14 }
   0x3   :  { %s30_s16 = sshll.u32 %s362_s15, 4  ;;  %s15_s19 = sshll.u32 %s422_s0, 4  ;;  %s31_s16 = int_to_ptr.vmem [resolvable:$true] %s30_s16  ;;  %s16_s19 = int_to_ptr.hbm [resolvable:$true] %s15_s19 }
   0x4   :  { %s363_s20 = smov 128   ;;  %s364_s21 = smov 8  }
   0x5   :  { %36 = dma.hbm_to_vmem [thread:$0]  %s29_s14, 512, %s31_s16, [#allocation7], %s363_s20, %s363_s20, %s364_s21  }
   0x6   :  { %s365_s22 = smov [#allocation3]   ;;  %s41_s1 = sshll.u32 %s424_s2, 4  ;;  %s42_s1 = int_to_ptr.hbm [resolvable:$true] %s41_s1 }
   0x7   :  { %s17_s23 = sshll.u32 %s365_s22, 4  ;;  %s366_s0 = smov [#allocation8]   ;;  %s18_s23 = int_to_ptr.vmem [resolvable:$true] %s17_s23 }
   0x8   :  { %23 = dma.hbm_to_vmem [thread:$0]  %s16_s19, 256, %s18_s23, [#allocation4], %s363_s20, %s363_s20, %s364_s21  }
   0x9   :  { %s43_s26 = sshll.u32 %s366_s0, 4  ;;  %s44_s26 = int_to_ptr.vmem [resolvable:$true] %s43_s26 }
   0xa   :  { %49 = dma.hbm_to_vmem [thread:$0]  %s42_s1, 1024, %s44_s26, [#allocation7], %s363_s20, %s363_s20, %s364_s21  }
   0xb   :  { %356 = dma.done.wait [#allocation4], 256  }
   0xc   :  { %357 = vsyncadd [#allocation4], 4294967040 }
   0xd   :  { %358 = dma.done.wait [#allocation7], 1536  }
   0xe   :  { %359 = vsyncadd [#allocation7], 4294965760  ;;  %v74_v0 = vld [vmem:[#allocation6 + $0x18] sm:$0xff]  ;;  %v73_v1 = vld [vmem:[#allocation6 + $0x10] sm:$0xff]  ;;  %vm66_vm0 = vcmask 261120   ;;  %s367_s2 = smov 64  }
   0xf   :  { %94 = vmatpush.msra.mxu0 %v74_v0  ;;  %232 = vmatpush.msra.mxu3 %v74_v0  ;;  %v72_v2 = vld [vmem:[#allocation6 + $0x8] sm:$0xff]  ;;  %v71_v3 = vld [vmem:[#allocation6] sm:$0xff]  ;;  %v69_v4 = vld [vmem:[#allocation3] sm:$0xff]  ;;  %v368_v24 = vmov 0.0   ;;  %vm165_vm8 = vcmask 523264   ;;  %s369_s27 = smov [#allocation9]  }
  0x10   :  { %v70_v5 = vld [vmem:[#allocation3 + $0x8] sm:$0xff]  ;;  %v163_v7 = vld [vmem:[#allocation8 + $0x30] sm:$0xff]  ;;  %v162_v8 = vld [vmem:[#allocation8 + $0x28] sm:$0xff]  ;;  %68 = vst.msk [vmem:[#allocation2 + $0x8] sm:$0xff] %vm66_vm0, %v368_v24  ;;  %s210_s28 = sshll.u32 %s369_s27, 4  ;;  %s212_s4 = sshll.u32 %s425_s3, 4  ;;  %s211_s28 = int_to_ptr.vmem [resolvable:$true] %s210_s28  ;;  %s213_s4 = int_to_ptr.hbm [resolvable:$true] %s212_s4 }
  0x11   :  { %95 = vmatpush.msra.mxu0 %v73_v1  ;;  %233 = vmatpush.msra.mxu3 %v73_v1  ;;  %v164_v6 = vld [vmem:[#allocation8 + $0x38] sm:$0xff]  ;;  %v161_v10 = vld [vmem:[#allocation8 + $0x20] sm:$0xff]  ;;  %v159_v12 = vld [vmem:[#allocation8 + $0x10] sm:$0xff]  ;;  %67 = vst.msk [vmem:[#allocation2] sm:$0xff] %vm66_vm0, %v368_v24 }
  0x12   :  { %236 = vmatpush.msra.mxu2 %v164_v6  ;;  %180 = vmatpush.msra.mxu1 %v164_v6  ;;  %v160_v11 = vld [vmem:[#allocation8 + $0x18] sm:$0xff]  ;;  %v158_v13 = vld [vmem:[#allocation8 + $0x8] sm:$0xff]  ;;  %v157_v20 = vld [vmem:[#allocation8] sm:$0xff] }
  0x13   :  { %96 = vmatpush.msra.mxu0 %v72_v2  ;;  %234 = vmatpush.msra.mxu3 %v72_v2 }
  0x14   :  { %237 = vmatpush.msra.mxu2 %v163_v7  ;;  %181 = vmatpush.msra.mxu1 %v163_v7 }
  0x15   :  { %97 = vmatpush.msra.mxu0 %v71_v3  ;;  %235 = vmatpush.msra.mxu3 %v71_v3 }
  0x16   :  { %226 = vmatmul.msk.f32.vlgmr.msra.gmra.mxu0 %vm66_vm0, %v69_v4  ;;  %227 = vmatmul.msk.f32.vlgmr.msra.gmra.mxu3 %vm66_vm0, %v70_v5 }
  0x17   :  { %238 = vmatpush.msra.mxu2 %v162_v8  ;;  %182 = vmatpush.msra.mxu1 %v162_v8  ;;  %v156_v49 = vld [vmem:[#allocation2 + $0x8] sm:$0xff] }
  0x18   :  { %v155_v51 = vld [vmem:[#allocation2] sm:$0xff] }
  0x19   :  { %239 = vmatpush.msra.mxu2 %v161_v10  ;;  %183 = vmatpush.msra.mxu1 %v161_v10 }
  0x1b   :  { %240 = vmatpush.msra.mxu2 %v160_v11  ;;  %184 = vmatpush.msra.mxu1 %v160_v11 }
  0x1d   :  { %241 = vmatpush.msra.mxu2 %v159_v12  ;;  %185 = vmatpush.msra.mxu1 %v159_v12 }
  0x1f   :  { %242 = vmatpush.msra.mxu2 %v158_v13  ;;  %186 = vmatpush.msra.mxu1 %v158_v13 }
  0x21   :  { %243 = vmatpush.msra.mxu2 %v157_v20  ;;  %187 = vmatpush.msra.mxu1 %v157_v20 }
  0x93   :  { %v99_v14 = vpop.f32.mrf.mxu0 }
  0x94   :  { %v228_v16 = vmul.f32 -1.442695, %v99_v14 }
  0x99   :  { %v102_v9 = vpop.f32.mrf.mxu3 }
  0x9a   :  { %149 = vrot.lane.b32.xlu0 %v102_v9, %s367_s2  ;;  %v229_v15 = vmul.f32 -1.442695, %v102_v9 }
  0x9c   :  { %252 = vpow2.f32 %v229_v15 }
  0x9d   :  { %254 = vpow2.f32 %v228_v16 }
  0xa2   :  { %147 = vrot.lane.b32.xlu0 %v99_v14, %s367_s2  ;;  %v253_v17 = vpop.eup %252 }
  0xa3   :  { %v112_v18 = vadd.f32 1.0, %v253_v17  ;;  %v255_v19 = vpop.eup %254 }
  0xa4   :  { %v111_v21 = vadd.f32 1.0, %v255_v19 }
  0xa5   :  { %256 = vrcp.f32 %v112_v18  ;;  %v139_v31 = vand.u32 2147483648, %v112_v18  ;;  %vm133_vm2 = vweird.f32 %v112_v18  ;;  %v137_v32 = vand.u32 2147483647, %v112_v18 }
  0xa6   :  { %258 = vrcp.f32 %v111_v21  ;;  %vm118_vm4 = vweird.f32 %v111_v21  ;;  %v124_v36 = vand.u32 2147483648, %v111_v21  ;;  %v122_v39 = vand.u32 2147483647, %v111_v21 }
  0xa7   :  { %v140_v35 = vor.u32 1.1754944e-38, %v139_v31  ;;  %vm138_vm6 = vcmp.eq.f32.partialorder %v137_v32, 8.507059e+37 }
  0xa8   :  { %v125_v41 = vor.u32 1.1754944e-38, %v124_v36  ;;  %vm123_vm9 = vcmp.eq.f32.partialorder %v122_v39, 8.507059e+37 }
  0xab   :  { %v257_v22 = vpop.eup %256 }
  0xac   :  { %v129_v23 = vmul.f32 %v257_v22, %v112_v18  ;;  %v259_v26 = vpop.eup %258  ;;  %vm134_vm1 = vweird.f32 %v257_v22 }
  0xad   :  { %v114_v27 = vmul.f32 %v259_v26, %v111_v21  ;;  %vm135_vm3 = vmor %vm133_vm2, %vm134_vm1  ;;  %vm119_vm5 = vweird.f32 %v259_v26 }
  0xae   :  { %v130_v25 = vsub.f32 1.0, %v129_v23  ;;  %vm120_vm7 = vmor %vm118_vm4, %vm119_vm5 }
  0xaf   :  { %v115_v29 = vsub.f32 1.0, %v114_v27 }
  0xb0   :  { %v131_v28 = vmul.f32 %v257_v22, %v130_v25 }
  0xb1   :  { %v116_v33 = vmul.f32 %v259_v26, %v115_v29 }
  0xb2   :  { %v132_v30 = vadd.f32 %v257_v22, %v131_v28 }
  0xb3   :  { %v117_v38 = vadd.f32 %v259_v26, %v116_v33 }
  0xb4   :  { %v136_v34 = vsel %vm135_vm3, %v257_v22, %v132_v30 }
  0xb5   :  { %v141_v37 = vsel %vm138_vm6, %v140_v35, %v136_v34  ;;  %v121_v43 = vsel %vm120_vm7, %v259_v26, %v117_v38 }
  0xb6   :  { %v144_v40 = vmul.f32 %v141_v37, %v102_v9  ;;  %v126_v45 = vsel %vm123_vm9, %v125_v41, %v121_v43 }
  0xb7   :  { %v143_v46 = vmul.f32 %v126_v45, %v99_v14 }
 0x10c   :  { %v150_v42 = vpop.permute.xlu0 %149 }
 0x10d   :  { %v154_v44 = vmul.f32 %v150_v42, %v144_v40 }
 0x10f   :  { %231 = vmatmul.msk.f32.vlgmr.msra.gmra.mxu2 %vm165_vm8, %v154_v44 }
 0x114   :  { %v148_v47 = vpop.permute.xlu0 %147 }
 0x115   :  { %v153_v48 = vmul.f32 %v148_v47, %v143_v46 }
 0x117   :  { %230 = vmatmul.msk.f32.vlgmr.msra.gmra.mxu1 %vm165_vm8, %v153_v48 }
 0x192   :  { %v192_v50 = vpop.f32.mrf.mxu2 }
 0x193   :  { %v196_v52 = vadd.f32 %v192_v50, %v156_v49 }
 0x194   :  { %v189_v53 = vpop.f32.mrf.mxu1 }
 0x195   :  { %198 = vst.msk [vmem:[#allocation2 + $0x8] sm:$0xff] %vm66_vm0, %v196_v52  ;;  %v195_v54 = vadd.f32 %v189_v53, %v155_v51 }
 0x197   :  { %197 = vst.msk [vmem:[#allocation2] sm:$0xff] %vm66_vm0, %v195_v54 }
 0x19c   :  { %v203_v55 = vld [vmem:[#allocation2 + $0x8] sm:$0xff] }
 0x19d   :  { %205 = vst.msk [vmem:[#allocation9 + $0x8] sm:$0xff] %vm66_vm0, %v203_v55 }
 0x19e   :  { %v202_v56 = vld [vmem:[#allocation2] sm:$0xff] }
 0x19f   :  { %204 = vst.msk [vmem:[#allocation9] sm:$0xff] %vm66_vm0, %v202_v56 }
 0x1a0   :  { %218 = dma.vmem_to_hbm [thread:$0]  %s211_s28, 256, %s213_s4, [#allocation5], %s363_s20, %s363_s20, %s364_s21  }
 0x1a1   :  { %360 = dma.done.wait [#allocation5], 256  }
 0x1a2   :  { %361 = vsyncadd [#allocation5], 4294967040 }
 0x1a3   :  { %223 = vsyncpa [#allocation4], 1 }
 0x1a4   :  { %224 = vsyncpa [#allocation7], 1 }
 0x1a5   :  { %225 = vsyncpa [#allocation5], 1 }

</bundles_post_ra>
